<compile_context>
chip_gen: v6e
topology: v6e:2x2x1
jax: 0.10.0
libtpu: 0.0.40
codegen_flags: <defaults>
</compile_context>

<pallas_src>
import math

import jax
import jax.numpy as jnp
from jax.experimental import pallas as pl
from jax.experimental.pallas import tpu as pltpu


def _mlp_policy_kernel(obs_ref,
                       w0_ref, b0_ref,
                       w1_ref, b1_ref,
                       w2_ref, b2_ref,
                       mean_ref):
    """One batch tile of the MLP forward.

    obs:  [TB, ob_dim] f32 (pipelined per grid step)
    w*:   [in, out]    f32 (pre-transposed in the wrapper; VMEM-resident)
    b*:   [1, out]     f32 (VMEM-resident)
    mean: [TB, ac_dim] f32
    """
    x = obs_ref[...]

    # hidden layer 0: Linear + Tanh
    h = jnp.dot(x, w0_ref[...], preferred_element_type=jnp.float32)
    h = jnp.tanh(h + b0_ref[...])

    # hidden layer 1: Linear + Tanh
    h = jnp.dot(h, w1_ref[...], preferred_element_type=jnp.float32)
    h = jnp.tanh(h + b1_ref[...])

    # output layer: Linear (no activation) -> mean of the action distribution
    m = jnp.dot(h, w2_ref[...], preferred_element_type=jnp.float32)
    mean_ref[...] = (m + b2_ref[...]).astype(mean_ref.dtype)


def _round_up(x, m):
    return ((x + m - 1) // m) * m


def mlp_policy_forward(obs, params, *, tb=1024):
    """Runs the MLPPolicySL forward pass via a batch-tiled Pallas call.

    Returns (mean, std) — the parameters of the Normal action distribution.
    """
    w0, b0, w1, b1, w2, b2, logstd = params
    B, ob_dim = obs.shape
    size = w0.shape[0]
    ac_dim = w2.shape[0]

    # Batch tile: multiple of 8 (sublane); pad the batch only if needed.
    TB = min(tb, _round_up(B, 8))
    Bp = _round_up(B, TB)
    grid = (Bp // TB,)
    obs_p = obs if Bp == B else jnp.pad(obs, ((0, Bp - B), (0, 0)))

    # Tiny one-time param reshapes (KB-scale): PyTorch [out, in] -> [in, out],
    # biases -> [1, out] rows so they broadcast over the batch tile in-kernel.
    w0t, w1t, w2t = w0.T, w1.T, w2.T
    b0r, b1r, b2r = b0.reshape(1, -1), b1.reshape(1, -1), b2.reshape(1, -1)

    # Weights / biases: same block index every grid step => resident in VMEM.
    resident = lambda a: pl.BlockSpec(a.shape, lambda i: (0, 0))

    flops = 2 * Bp * (ob_dim * size + size * size + size * ac_dim)
    transcendentals = 2 * Bp * size
    bytes_accessed = (obs_p.size * 4
                      + (w0t.size + w1t.size + w2t.size) * 4
                      + (b0r.size + b1r.size + b2r.size) * 4
                      + Bp * ac_dim * 4)

    mean_p = pl.pallas_call(
        _mlp_policy_kernel,
        out_shape=jax.ShapeDtypeStruct((Bp, ac_dim), jnp.float32),
        grid_spec=pltpu.PrefetchScalarGridSpec(
            num_scalar_prefetch=0,
            grid=grid,
            in_specs=[
                pl.BlockSpec((TB, ob_dim), lambda i: (i, 0)),  # pipelined obs tiles
                resident(w0t), resident(b0r),
                resident(w1t), resident(b1r),
                resident(w2t), resident(b2r),
            ],
            out_specs=pl.BlockSpec((TB, ac_dim), lambda i: (i, 0)),
        ),
        compiler_params=pltpu.CompilerParams(
            dimension_semantics=("parallel",)),    # megacore sharding on v7x
        cost_estimate=pl.CostEstimate(
            flops=flops,
            transcendentals=transcendentals,
            bytes_accessed=bytes_accessed),
    )(obs_p, w0t, b0r, w1t, b1r, w2t, b2r)

    mean = mean_p if Bp == B else mean_p[:B]
    # std = exp(logstd): pure broadcast of a tiny vector — kept out of the
    # kernel so the kernel only writes `mean` back to HBM.
    std = jnp.broadcast_to(jnp.exp(logstd)[None, :], mean.shape)
    return mean, std


def init_params(key, ob_dim, ac_dim, size):
    """Deterministic init mimicking nn.Linear's U(-1/sqrt(fan_in), 1/sqrt(fan_in)).

    Weights are stored in PyTorch layout [out_features, in_features]; biases as
    [out_features]; logstd is zeros, exactly as in MLPPolicySL.__init__.
    """
    keys = jax.random.split(key, 6)

    def linear(kw, kb, fan_in, fan_out):
        bound = 1.0 / math.sqrt(fan_in)
        w = jax.random.uniform(kw, (fan_out, fan_in), jnp.float32, -bound, bound)
        b = jax.random.uniform(kb, (fan_out,), jnp.float32, -bound, bound)
        return w, b

    w0, b0 = linear(keys[0], keys[1], ob_dim, size)
    w1, b1 = linear(keys[2], keys[3], size, size)
    w2, b2 = linear(keys[4], keys[5], size, ac_dim)
    logstd = jnp.zeros((ac_dim,), jnp.float32)   # nn.Parameter(torch.zeros(ac_dim))
    return (w0, b0, w1, b1, w2, b2, logstd)


def reference_forward(obs, params):
    """Plain-JAX (f32) reference matching the PyTorch mean_net forward."""
    w0, b0, w1, b1, w2, b2, logstd = params
    h = jnp.tanh(obs @ w0.T + b0[None, :])
    h = jnp.tanh(h @ w1.T + b1[None, :])
    mean = h @ w2.T + b2[None, :]
    std = jnp.broadcast_to(jnp.exp(logstd)[None, :], mean.shape)
    return mean, std


def _check(obs, params, **kw):
    mean, std = mlp_policy_forward(obs, params, **kw)
    jax.block_until_ready((mean, std))
    mean_ref, std_ref = reference_forward(obs, params)
    assert mean.shape == mean_ref.shape and std.shape == std_ref.shape
    assert jnp.allclose(mean, mean_ref, atol=1e-2, rtol=1e-2), (
        float(jnp.max(jnp.abs(mean - mean_ref))))
    assert jnp.allclose(std, std_ref, atol=1e-6, rtol=1e-6)


if __name__ == "__main__":
    # Small shapes consistent with the module: n_layers=2, hidden size=32.
    batch, ob_dim, ac_dim, size = 8, 16, 4, 32

    key = jax.random.PRNGKey(0)
    k_obs, k_obs2, k_params = jax.random.split(key, 3)

    params = init_params(k_params, ob_dim, ac_dim, size)

    # Single-tile path (grid=(1,), no padding).
    obs = jax.random.normal(k_obs, (batch, ob_dim), jnp.float32)
    _check(obs, params)

    # Multi-tile + ragged-batch path (grid=(3,), padded batch, sliced output).
    obs2 = jax.random.normal(k_obs2, (300, ob_dim), jnp.float32)
    _check(obs2, params, tb=128)

    # TODO(synk): distributions.Normal construction / sampling / log_prob and
    # the Adam update step are host-side PyTorch logic, not kernel work;
    # (mean, std) fully parameterize the returned distribution.

    print("KERNEL_OK")
</pallas_src>

<mosaic_0001>
module attributes {stable_mosaic.version = 11 : i64} {
  func.func @_mlp_policy_kernel(%arg0: i32, %arg1: memref<8x16xf32, #tpu.memory_space<vmem>>, %arg2: memref<16x32xf32, #tpu.memory_space<vmem>>, %arg3: memref<1x32xf32, #tpu.memory_space<vmem>>, %arg4: memref<32x32xf32, #tpu.memory_space<vmem>>, %arg5: memref<1x32xf32, #tpu.memory_space<vmem>>, %arg6: memref<32x4xf32, #tpu.memory_space<vmem>>, %arg7: memref<1x4xf32, #tpu.memory_space<vmem>>, %arg8: memref<8x4xf32, #tpu.memory_space<vmem>>) attributes {dimension_semantics = [#tpu.dimension_semantics<parallel>], iteration_bounds = array<i64: 1>, scalar_prefetch = 0 : i64, scratch_operands = 0 : i64, tpu.core_type = #tpu.core_type<tc>, window_params = [{transform_indices = @transform_0, window_bounds = array<i64: 8, 16>}, {pipeline_mode = #tpu.pipeline_mode<synchronous>, transform_indices = @transform_1, window_bounds = array<i64: 16, 32>}, {pipeline_mode = #tpu.pipeline_mode<synchronous>, transform_indices = @transform_2, window_bounds = array<i64: 1, 32>}, {pipeline_mode = #tpu.pipeline_mode<synchronous>, transform_indices = @transform_3, window_bounds = array<i64: 32, 32>}, {pipeline_mode = #tpu.pipeline_mode<synchronous>, transform_indices = @transform_4, window_bounds = array<i64: 1, 32>}, {pipeline_mode = #tpu.pipeline_mode<synchronous>, transform_indices = @transform_5, window_bounds = array<i64: 32, 4>}, {pipeline_mode = #tpu.pipeline_mode<synchronous>, transform_indices = @transform_6, window_bounds = array<i64: 1, 4>}, {transform_indices = @transform_7, window_bounds = array<i64: 8, 4>}]} {
    %c0 = arith.constant 0 : index
    %c0_0 = arith.constant 0 : index
    %0 = vector.load %arg1[%c0, %c0_0] : memref<8x16xf32, #tpu.memory_space<vmem>>, vector<8x16xf32>
    %c0_1 = arith.constant 0 : index
    %c0_2 = arith.constant 0 : index
    %1 = vector.load %arg2[%c0_1, %c0_2] : memref<16x32xf32, #tpu.memory_space<vmem>>, vector<16x32xf32>
    %cst = arith.constant dense<0.000000e+00> : vector<8x32xf32>
    %2 = tpu.matmul %0, %1, %cst {dimension_numbers = #tpu.dot_dimension_numbers<[1], [0], [0], [1], [0, 0, 1, 1], [], []>} : vector<8x16xf32>, vector<16x32xf32>, vector<8x32xf32> -> vector<8x32xf32>
    %c0_3 = arith.constant 0 : index
    %c0_4 = arith.constant 0 : index
    %3 = vector.load %arg3[%c0_3, %c0_4] : memref<1x32xf32, #tpu.memory_space<vmem>>, vector<1x32xf32>
    %4 = vector.broadcast %3 : vector<1x32xf32> to vector<8x32xf32>
    %5 = arith.addf %2, %4 : vector<8x32xf32>
    %6 = math.tanh %5 : vector<8x32xf32>
    %c0_5 = arith.constant 0 : index
    %c0_6 = arith.constant 0 : index
    %7 = vector.load %arg4[%c0_5, %c0_6] : memref<32x32xf32, #tpu.memory_space<vmem>>, vector<32x32xf32>
    %cst_7 = arith.constant dense<0.000000e+00> : vector<8x32xf32>
    %8 = tpu.matmul %6, %7, %cst_7 {dimension_numbers = #tpu.dot_dimension_numbers<[1], [0], [0], [1], [0, 0, 1, 1], [], []>} : vector<8x32xf32>, vector<32x32xf32>, vector<8x32xf32> -> vector<8x32xf32>
    %c0_8 = arith.constant 0 : index
    %c0_9 = arith.constant 0 : index
    %9 = vector.load %arg5[%c0_8, %c0_9] : memref<1x32xf32, #tpu.memory_space<vmem>>, vector<1x32xf32>
    %10 = vector.broadcast %9 : vector<1x32xf32> to vector<8x32xf32>
    %11 = arith.addf %8, %10 : vector<8x32xf32>
    %12 = math.tanh %11 : vector<8x32xf32>
    %c0_10 = arith.constant 0 : index
    %c0_11 = arith.constant 0 : index
    %13 = vector.load %arg6[%c0_10, %c0_11] : memref<32x4xf32, #tpu.memory_space<vmem>>, vector<32x4xf32>
    %cst_12 = arith.constant dense<0.000000e+00> : vector<8x4xf32>
    %14 = tpu.matmul %12, %13, %cst_12 {dimension_numbers = #tpu.dot_dimension_numbers<[1], [0], [0], [1], [0, 0, 1, 1], [], []>} : vector<8x32xf32>, vector<32x4xf32>, vector<8x4xf32> -> vector<8x4xf32>
    %c0_13 = arith.constant 0 : index
    %c0_14 = arith.constant 0 : index
    %15 = vector.load %arg7[%c0_13, %c0_14] : memref<1x4xf32, #tpu.memory_space<vmem>>, vector<1x4xf32>
    %16 = vector.broadcast %15 : vector<1x4xf32> to vector<8x4xf32>
    %17 = arith.addf %14, %16 : vector<8x4xf32>
    %c0_15 = arith.constant 0 : index
    %c0_16 = arith.constant 0 : index
    %18 = vector.load %arg8[%c0_15, %c0_16] : memref<8x4xf32, #tpu.memory_space<vmem>>, vector<8x4xf32>
    tpu.vector_store %arg8[%c0_15, %c0_16], %17 {strides = array<i32>} : memref<8x4xf32, #tpu.memory_space<vmem>>, vector<8x4xf32>,
    return
  }
  func.func @transform_0(%arg0: i32) -> (i32, i32) {
    %c0_i32 = arith.constant 0 : i32
    %c0_i32_0 = arith.constant 0 : i32
    return %arg0, %c0_i32 : i32, i32
  }
  func.func @transform_1(%arg0: i32) -> (i32, i32) {
    %c0_i32 = arith.constant 0 : i32
    %c0_i32_0 = arith.constant 0 : i32
    %c0_i32_1 = arith.constant 0 : i32
    return %c0_i32, %c0_i32_0 : i32, i32
  }
  func.func @transform_2(%arg0: i32) -> (i32, i32) {
    %c0_i32 = arith.constant 0 : i32
    %c0_i32_0 = arith.constant 0 : i32
    %c0_i32_1 = arith.constant 0 : i32
    return %c0_i32, %c0_i32_0 : i32, i32
  }
  func.func @transform_3(%arg0: i32) -> (i32, i32) {
    %c0_i32 = arith.constant 0 : i32
    %c0_i32_0 = arith.constant 0 : i32
    %c0_i32_1 = arith.constant 0 : i32
    return %c0_i32, %c0_i32_0 : i32, i32
  }
  func.func @transform_4(%arg0: i32) -> (i32, i32) {
    %c0_i32 = arith.constant 0 : i32
    %c0_i32_0 = arith.constant 0 : i32
    %c0_i32_1 = arith.constant 0 : i32
    return %c0_i32, %c0_i32_0 : i32, i32
  }
  func.func @transform_5(%arg0: i32) -> (i32, i32) {
    %c0_i32 = arith.constant 0 : i32
    %c0_i32_0 = arith.constant 0 : i32
    %c0_i32_1 = arith.constant 0 : i32
    return %c0_i32, %c0_i32_0 : i32, i32
  }
  func.func @transform_6(%arg0: i32) -> (i32, i32) {
    %c0_i32 = arith.constant 0 : i32
    %c0_i32_0 = arith.constant 0 : i32
    %c0_i32_1 = arith.constant 0 : i32
    return %c0_i32, %c0_i32_0 : i32, i32
  }
  func.func @transform_7(%arg0: i32) -> (i32, i32) {
    %c0_i32 = arith.constant 0 : i32
    %c0_i32_0 = arith.constant 0 : i32
    return %arg0, %c0_i32 : i32, i32
  }
}

</mosaic_0001>

<bundles_post_ra>
// kernel: tpu_custom_call.1
= control target key start
LH: loop header
LB: loop body
LE: loop exit
PB: predicated region body
PF: predicated region fallthrough
CT: control target
= control target key end

     0   :  { %12 = vsyncpa [#allocation3], 0  ;;  %s507_s0 = inlined_call_operand.vmem [shape: f32[8,16], index: 0, kind: input, shape index: {}]   ;;  %s508_s1 = inlined_call_operand.hbm [shape: f32[16,32], index: 1, kind: input, shape index: {}]   ;;  %s509_s2 = inlined_call_operand.vmem [shape: f32[1,32], index: 2, kind: input, shape index: {}]   ;;  %s510_s3 = inlined_call_operand.vmem [shape: f32[32,32], index: 3, kind: input, shape index: {}]   ;;  %s511_s4 = inlined_call_operand.hbm [shape: f32[1,32], index: 4, kind: input, shape index: {}]   ;;  %s512_s5 = inlined_call_operand.vmem [shape: f32[32,4], index: 5, kind: input, shape index: {}]   ;;  %s513_s6 = inlined_call_operand.vmem [shape: f32[1,4], index: 6, kind: input, shape index: {}]   ;;  %s514_s7 = inlined_call_operand.vmem [shape: f32[8,4], index: 7, kind: output, shape index: {}]  }
   0x1   :  { %13 = vsyncpa [#allocation5], 0  ;;  %s417_s24 = smov [#allocation2]  }
   0x2   :  { %s21_s25 = sshll.u32 %s417_s24, 4  ;;  %s22_s25 = int_to_ptr.vmem [resolvable:$true] %s21_s25 }
   0x3   :  { %s381_s26 = scalar_lea.vmem %s22_s25, 256  ;;  %p386_p1 = scmp.lt.s32.totalorder %s22_s25, %s22_s25 }
   0x4   :  { %p382_p0 = scmp.ne.s32.totalorder %s22_s25, %s381_s26  ;;  %p387_p2 = scmp.lt.s32.totalorder %s381_s26, %s381_s26 }
   0x6   :  { %p388_p3 = por %p387_p2, %p386_p1 }
   0x8   :  { %p389_p4 = pnand %p388_p3, %p382_p0 }
   0xa   :  { %392 = shalt.err (!%p389_p4)
}
   0xb   :  { %s418_s27 = smov 128   ;;  %s419_s28 = smov 8  }
   0xc   :  { %27 = dma.hbm_to_vmem [thread:$0]  %s508_s1, 256, %s22_s25, [#allocation3], %s418_s27, %s418_s27, %s419_s28  }
   0xd   :  { %s420_s8 = smov [#allocation4]  }
   0xe   :  { %s38_s9 = sshll.u32 %s420_s8, 4  ;;  %s39_s9 = int_to_ptr.vmem [resolvable:$true] %s38_s9 }
   0xf   :  { %s401_s10 = scalar_lea.vmem %s39_s9, 16  ;;  %s405_s11 = scalar_lea.vmem %s39_s9, 32 }
  0x10   :  { %p402_p5 = scmp.ne.s32.totalorder %s39_s9, %s401_s10  ;;  %p406_p6 = scmp.lt.s32.totalorder %s39_s9, %s39_s9 }
  0x11   :  { %p407_p7 = scmp.lt.s32.totalorder %s405_s11, %s401_s10 }
  0x13   :  { %p408_p8 = por %p407_p7, %p406_p6 }
  0x15   :  { %p409_p9 = pnand %p408_p8, %p402_p5 }
  0x17   :  { %412 = shalt.err (!%p409_p9)
}
  0x18   :  { %41 = dma.hbm_to_vmem [thread:$0]  %s511_s4, 16, %s39_s9, [#allocation5]  }
  0x19   :  { %413 = dma.done.wait [#allocation3], 256  }
  0x1a   :  { %414 = vsyncadd [#allocation3], 4294967040 }
  0x1b   :  { %415 = dma.done.wait [#allocation5], 16  }
  0x1c   :  { %416 = vsyncadd [#allocation5], 4294967280  ;;  %v421_v0 = vmov 0.0   ;;  %vm422_vm0 = vmmov 0   ;;  %v54_v1 = vld [vmem:[#allocation2 + $0x8] sm:$0xff]  ;;  %v53_v2 = vld [vmem:[#allocation2] sm:$0xff] }
  0x1d   :  { %334 = vmatprep.subr.mxu0 %v421_v0  ;;  %338 = vmatprep.mubr.msk.f32.mxu0 %vm422_vm0, %v421_v0  ;;  %v52_v3 = vld [vmem:[%s507_s0] sm:$0xff]  ;;  %vm62_vm1 = vcmask 130048   ;;  %v140_v4 = vld [vmem:[%s510_s3 + $0x18] sm:$0xff]  ;;  %v139_v5 = vld [vmem:[%s510_s3 + $0x10] sm:$0xff]  ;;  %vm148_vm2 = vcmask 261120   ;;  %vm307_vm3 = vcmask 31744  }
  0x1e   :  { %341 = vmatprep.subr.mxu1 %v421_v0  ;;  %349 = vmatprep.mubr.msk.f32.mxu1 %vm422_vm0, %v421_v0  ;;  %v138_v6 = vld [vmem:[%s510_s3 + $0x8] sm:$0xff]  ;;  %v137_v7 = vld [vmem:[%s510_s3] sm:$0xff]  ;;  %v226_v13 = vld [vmem:[%s512_s5 + $0x18] sm:$0xff] }
  0x1f   :  { %335 = vmatpush3.msra.mxu0 %v54_v1  ;;  %342 = vmatpush3.msra.mxu1 %v140_v4  ;;  %v315_v8 = vld [vmem:[%s509_s2] ss:$0 sm:$0xff]  ;;  %v225_v14 = vld [vmem:[%s512_s5 + $0x10] sm:$0xff]  ;;  %v224_v15 = vld [vmem:[%s512_s5 + $0x8] sm:$0xff] }
  0x20   :  { %336 = vmatprep.subr.mxu0 %v421_v0  ;;  %343 = vmatprep.subr.mxu1 %v421_v0  ;;  %v223_v16 = vld [vmem:[%s512_s5] sm:$0xff]  ;;  %v317_v17 = vld [vmem:[#allocation4] ss:$0 sm:$0xff] }
  0x21   :  { %337 = vmatpush3.msra.mxu0 %v53_v2  ;;  %344 = vmatpush3.msra.mxu1 %v139_v5  ;;  %v319_v22 = vld [vmem:[%s513_s6] ss:$0 sm:$0xff] }
  0x22   :  { %339 = vmatmul.mubr.msk.f32.vlgmr.msra.gmra.mxu0 %vm62_vm1, %v52_v3  ;;  %352 = vmatprep.subr.mxu0 %v421_v0 }
  0x23   :  { %360 = vmatprep.mubr.msk.f32.mxu0 %vm422_vm0, %v421_v0  ;;  %345 = vmatprep.subr.mxu1 %v421_v0 }
  0x24   :  { %346 = vmatpush3.msra.mxu1 %v138_v6  ;;  %353 = vmatpush3.msra.mxu0 %v226_v13 }
  0x25   :  { %347 = vmatprep.subr.mxu1 %v421_v0  ;;  %354 = vmatprep.subr.mxu0 %v421_v0 }
  0x26   :  { %348 = vmatpush3.msra.mxu1 %v137_v7  ;;  %355 = vmatpush3.msra.mxu0 %v225_v14 }
  0x27   :  { %356 = vmatprep.subr.mxu0 %v421_v0 }
  0x28   :  { %357 = vmatpush3.msra.mxu0 %v224_v15 }
  0x29   :  { %358 = vmatprep.subr.mxu0 %v421_v0 }
  0x2a   :  { %359 = vmatpush3.msra.mxu0 %v223_v16 }
  0xe2   :  { %v132_v9 = vpop.f32.mrf.mxu0 }
  0xe3   :  { %v133_v10 = vadd.f32 %v315_v8, %v132_v9 }
  0xe4   :  { %v340_v11 = vpop.f32.mrf.mxu0 }
  0xe5   :  { %369 = vtanh.f32 %v133_v10 }
  0xf2   :  { %v370_v12 = vpop.eup %369 }
  0xf3   :  { %350 = vmatmul.mubr.msk.f32.vlgmr.msra.gmra.mxu1 %vm148_vm2, %v370_v12 }
 0x1b3   :  { %v218_v18 = vpop.f32.mrf.mxu1 }
 0x1b4   :  { %v219_v19 = vadd.f32 %v317_v17, %v218_v18 }
 0x1b5   :  { %v351_v20 = vpop.f32.mrf.mxu1 }
 0x1b6   :  { %371 = vtanh.f32 %v219_v19 }
 0x1c3   :  { %v372_v21 = vpop.eup %371 }
 0x1c4   :  { %361 = vmatmul.mubr.msk.f32.vlgmr.msra.gmra.mxu0 %vm148_vm2, %v372_v21 }
 0x284   :  { %v303_v23 = vpop.f32.mrf.mxu0 }
 0x285   :  { %v304_v24 = vadd.f32 %v319_v22, %v303_v23 }
 0x286   :  { %v362_v25 = vpop.f32.mrf.mxu0 }
 0x287   :  { %308 = vst.msk [vmem:[%s514_s7] sm:$0xff] %vm307_vm3, %v304_v24 }
 0x288   :  { %313 = vsyncpa [#allocation3], 1 }
 0x289   :  { %314 = vsyncpa [#allocation5], 1 }

</bundles_post_ra>
